<compile_context>
chip_gen: v7x
topology: tpu7x:2x2x1
jax: 0.10.0
libtpu: 0.0.40
codegen_flags: <defaults>
</compile_context>

<pallas_src>
import functools

import jax
import jax.numpy as jnp
from jax.experimental import pallas as pl
from jax.experimental.pallas import tpu as pltpu


def _mlp_res_kernel(x_ref, w1_ref, b1_ref, wcat_ref, bcat_ref, o_ref):
    # x_ref:    (C_in, TN)
    # w1_ref:   (C_hid, C_in)       b1_ref:   (C_hid, 1)
    # wcat_ref: (C_out, C_hid+C_in) bcat_ref: (C_out, 1)   (bcat = b2 + bs)
    # o_ref:    (C_out, TN)
    x = x_ref[...]

    # conv_1 (1x1) + ReLU  -> (C_hid, TN)
    h = jnp.dot(w1_ref[...], x, preferred_element_type=jnp.float32) + b1_ref[...]
    h = jnp.maximum(h, 0.0)

    # conv_2 + conv_shortcut fused into one matmul:
    #   [w2 | ws] @ [h ; x] + (b2 + bs)
    cat = jnp.concatenate([h, x.astype(h.dtype)], axis=0)       # (C_hid+C_in, TN)
    out = jnp.dot(wcat_ref[...], cat, preferred_element_type=jnp.float32)
    out = out + bcat_ref[...]

    o_ref[...] = out.astype(o_ref.dtype)


def _pick_tile_n(n):
    # Largest MXU/lane-friendly tile that evenly divides N; fall back to full N.
    for t in (512, 256, 128):
        if n % t == 0:
            return t
    return n


@functools.partial(jax.jit, static_argnames=())
def mlp_res_pallas(x_ncw, params):
    """x_ncw: (B, in_dim, N) float32, matching the PyTorch Conv1d input layout."""
    w1, b1, w2, b2, ws, bs = params          # PyTorch layout: w (C_out, C_in)
    B, c_in, N = x_ncw.shape
    c_hid = w1.shape[0]
    c_out = w2.shape[0]

    # Fuse conv_2 / conv_shortcut weights once in the wrapper (free).
    w_cat = jnp.concatenate([w2, ws], axis=1)        # (C_out, C_hid + C_in)
    b_cat = (b2 + bs).reshape(c_out, 1)
    b1_col = b1.reshape(c_hid, 1)

    TN = _pick_tile_n(N)
    grid = (B, pl.cdiv(N, TN))

    dt_bytes = jnp.dtype(x_ncw.dtype).itemsize
    flops = 2 * B * N * (c_in * c_hid + (c_hid + c_in) * c_out)
    bytes_accessed = (
        B * N * (c_in + c_out) * dt_bytes
        + (c_hid * c_in + c_out * (c_hid + c_in) + c_hid + c_out) * 4
    )

    out = pl.pallas_call(
        _mlp_res_kernel,
        out_shape=jax.ShapeDtypeStruct((B, c_out, N), x_ncw.dtype),
        grid=grid,
        in_specs=[
            # Activations: tiled over batch (squeezed) and N; pipelined.
            pl.BlockSpec((None, c_in, TN), lambda b, n: (b, 0, n)),
            # Weights / biases: full blocks, constant index_map -> DMA'd once.
            pl.BlockSpec((c_hid, c_in), lambda b, n: (0, 0)),
            pl.BlockSpec((c_hid, 1), lambda b, n: (0, 0)),
            pl.BlockSpec((c_out, c_hid + c_in), lambda b, n: (0, 0)),
            pl.BlockSpec((c_out, 1), lambda b, n: (0, 0)),
        ],
        out_specs=pl.BlockSpec((None, c_out, TN), lambda b, n: (b, 0, n)),
        compiler_params=pltpu.CompilerParams(
            dimension_semantics=("parallel", "parallel"),
            vmem_limit_bytes=64 << 20,
        ),
        cost_estimate=pl.CostEstimate(
            flops=flops, transcendentals=0, bytes_accessed=bytes_accessed
        ),
    )(x_ncw, w1, b1_col, w_cat, b_cat)

    return out


def init_params(key, in_dim, hidden_dim, out_dim):
    """Deterministic init mimicking PyTorch Conv1d default (uniform +-1/sqrt(fan_in)).

    Weights are stored in PyTorch layout: (C_out, C_in)."""
    ks = jax.random.split(key, 6)

    def u(k, shape, fan_in):
        bound = 1.0 / jnp.sqrt(fan_in)
        return jax.random.uniform(k, shape, jnp.float32, -bound, bound)

    w1 = u(ks[0], (hidden_dim, in_dim), in_dim)       # conv_1.weight[:, :, 0]
    b1 = u(ks[1], (hidden_dim,), in_dim)
    w2 = u(ks[2], (out_dim, hidden_dim), hidden_dim)  # conv_2.weight[:, :, 0]
    b2 = u(ks[3], (out_dim,), hidden_dim)
    ws = u(ks[4], (out_dim, in_dim), in_dim)          # conv_shortcut.weight[:, :, 0]
    bs = u(ks[5], (out_dim,), in_dim)
    return (w1, b1, w2, b2, ws, bs)


def mlp_res_reference(x_ncw, params):
    """Pure-JAX reference of the PyTorch forward (NCW layout throughout)."""
    w1, b1, w2, b2, ws, bs = params
    h = jnp.maximum(jnp.einsum("oi,bin->bon", w1, x_ncw) + b1[None, :, None], 0.0)
    out = jnp.einsum("oh,bhn->bon", w2, h) + b2[None, :, None]
    sc = jnp.einsum("oi,bin->bon", ws, x_ncw) + bs[None, :, None]
    return out + sc


if __name__ == "__main__":
    B, in_dim, hidden_dim, out_dim, N = 2, 16, 32, 16, 256

    key = jax.random.PRNGKey(0)
    kx, kp = jax.random.split(key)
    x = jax.random.normal(kx, (B, in_dim, N), jnp.float32)
    params = init_params(kp, in_dim, hidden_dim, out_dim)

    y = mlp_res_pallas(x, params)
    y = jax.block_until_ready(y)

    y_ref = mlp_res_reference(x, params)
    assert y.shape == (B, out_dim, N)
    assert jnp.allclose(y, y_ref, atol=1e-5, rtol=1e-5)

    print("KERNEL_OK")
</pallas_src>

<mosaic_0001>
module attributes {stable_mosaic.version = 11 : i64} {
  func.func @_mlp_res_kernel(%arg0: i32, %arg1: i32, %arg2: memref<1x16x256xf32, #tpu.memory_space<vmem>>, %arg3: memref<32x16xf32, #tpu.memory_space<vmem>>, %arg4: memref<32x1xf32, #tpu.memory_space<vmem>>, %arg5: memref<16x48xf32, #tpu.memory_space<vmem>>, %arg6: memref<16x1xf32, #tpu.memory_space<vmem>>, %arg7: memref<1x16x256xf32, #tpu.memory_space<vmem>>) attributes {dimension_semantics = [#tpu.dimension_semantics<parallel>, #tpu.dimension_semantics<parallel>], iteration_bounds = array<i64: 2, 1>, scalar_prefetch = 0 : i64, scratch_operands = 0 : i64, tpu.core_type = #tpu.core_type<tc>, window_params = [{transform_indices = @transform_0, window_bounds = array<i64: 1, 16, 256>}, {pipeline_mode = #tpu.pipeline_mode<synchronous>, transform_indices = @transform_1, window_bounds = array<i64: 32, 16>}, {pipeline_mode = #tpu.pipeline_mode<synchronous>, transform_indices = @transform_2, window_bounds = array<i64: 32, 1>}, {pipeline_mode = #tpu.pipeline_mode<synchronous>, transform_indices = @transform_3, window_bounds = array<i64: 16, 48>}, {pipeline_mode = #tpu.pipeline_mode<synchronous>, transform_indices = @transform_4, window_bounds = array<i64: 16, 1>}, {transform_indices = @transform_5, window_bounds = array<i64: 1, 16, 256>}]} {
    %c0 = arith.constant 0 : index
    %c0_0 = arith.constant 0 : index
    %c0_1 = arith.constant 0 : index
    %0 = vector.load %arg2[%c0, %c0_0, %c0_1] : memref<1x16x256xf32, #tpu.memory_space<vmem>>, vector<1x16x256xf32>
    %1 = vector.shape_cast %0 : vector<1x16x256xf32> to vector<16x256xf32>
    %c0_2 = arith.constant 0 : index
    %c0_3 = arith.constant 0 : index
    %2 = vector.load %arg3[%c0_2, %c0_3] : memref<32x16xf32, #tpu.memory_space<vmem>>, vector<32x16xf32>
    %cst = arith.constant dense<0.000000e+00> : vector<32x256xf32>
    %3 = tpu.matmul %2, %1, %cst {dimension_numbers = #tpu.dot_dimension_numbers<[1], [0], [0], [1], [0, 0, 1, 1], [], []>} : vector<32x16xf32>, vector<16x256xf32>, vector<32x256xf32> -> vector<32x256xf32>
    %c0_4 = arith.constant 0 : index
    %c0_5 = arith.constant 0 : index
    %4 = vector.load %arg4[%c0_4, %c0_5] : memref<32x1xf32, #tpu.memory_space<vmem>>, vector<32x1xf32>
    %5 = vector.broadcast %4 : vector<32x1xf32> to vector<32x256xf32>
    %6 = arith.addf %3, %5 : vector<32x256xf32>
    %cst_6 = arith.constant 0.000000e+00 : f32
    %7 = vector.broadcast %cst_6 : f32 to vector<32x256xf32>
    %8 = arith.maximumf %6, %7 : vector<32x256xf32>
    %9 = tpu.concatenate %8, %1 in 0 : vector<32x256xf32>, vector<16x256xf32> -> vector<48x256xf32>
    %c0_7 = arith.constant 0 : index
    %c0_8 = arith.constant 0 : index
    %10 = vector.load %arg5[%c0_7, %c0_8] : memref<16x48xf32, #tpu.memory_space<vmem>>, vector<16x48xf32>
    %cst_9 = arith.constant dense<0.000000e+00> : vector<16x256xf32>
    %11 = tpu.matmul %10, %9, %cst_9 {dimension_numbers = #tpu.dot_dimension_numbers<[1], [0], [0], [1], [0, 0, 1, 1], [], []>} : vector<16x48xf32>, vector<48x256xf32>, vector<16x256xf32> -> vector<16x256xf32>
    %c0_10 = arith.constant 0 : index
    %c0_11 = arith.constant 0 : index
    %12 = vector.load %arg6[%c0_10, %c0_11] : memref<16x1xf32, #tpu.memory_space<vmem>>, vector<16x1xf32>
    %13 = vector.broadcast %12 : vector<16x1xf32> to vector<16x256xf32>
    %14 = arith.addf %11, %13 : vector<16x256xf32>
    %c0_12 = arith.constant 0 : index
    %c0_13 = arith.constant 0 : index
    %c0_14 = arith.constant 0 : index
    %15 = vector.load %arg7[%c0_12, %c0_13, %c0_14] : memref<1x16x256xf32, #tpu.memory_space<vmem>>, vector<1x16x256xf32>
    %16 = vector.shape_cast %15 : vector<1x16x256xf32> to vector<16x256xf32>
    %17 = vector.shape_cast %14 : vector<16x256xf32> to vector<1x16x256xf32>
    tpu.vector_store %arg7[%c0_12, %c0_13, %c0_14], %17 {strides = array<i32>} : memref<1x16x256xf32, #tpu.memory_space<vmem>>, vector<1x16x256xf32>,
    return
  }
  func.func @transform_0(%arg0: i32, %arg1: i32) -> (i32, i32, i32) {
    %c0_i32 = arith.constant 0 : i32
    %c0_i32_0 = arith.constant 0 : i32
    return %arg0, %c0_i32, %arg1 : i32, i32, i32
  }
  func.func @transform_1(%arg0: i32, %arg1: i32) -> (i32, i32) {
    %c0_i32 = arith.constant 0 : i32
    %c0_i32_0 = arith.constant 0 : i32
    %c0_i32_1 = arith.constant 0 : i32
    return %c0_i32, %c0_i32_0 : i32, i32
  }
  func.func @transform_2(%arg0: i32, %arg1: i32) -> (i32, i32) {
    %c0_i32 = arith.constant 0 : i32
    %c0_i32_0 = arith.constant 0 : i32
    %c0_i32_1 = arith.constant 0 : i32
    return %c0_i32, %c0_i32_0 : i32, i32
  }
  func.func @transform_3(%arg0: i32, %arg1: i32) -> (i32, i32) {
    %c0_i32 = arith.constant 0 : i32
    %c0_i32_0 = arith.constant 0 : i32
    %c0_i32_1 = arith.constant 0 : i32
    return %c0_i32, %c0_i32_0 : i32, i32
  }
  func.func @transform_4(%arg0: i32, %arg1: i32) -> (i32, i32) {
    %c0_i32 = arith.constant 0 : i32
    %c0_i32_0 = arith.constant 0 : i32
    %c0_i32_1 = arith.constant 0 : i32
    return %c0_i32, %c0_i32_0 : i32, i32
  }
  func.func @transform_5(%arg0: i32, %arg1: i32) -> (i32, i32, i32) {
    %c0_i32 = arith.constant 0 : i32
    %c0_i32_0 = arith.constant 0 : i32
    return %arg0, %c0_i32, %arg1 : i32, i32, i32
  }
}

</mosaic_0001>

<bundles_post_ra>
// kernel: mlp_res_pallas.1
= control target key start
LH: loop header
LB: loop body
LE: loop exit
PB: predicated region body
PF: predicated region fallthrough
CT: control target
= control target key end

     0   :  { %10 = vsyncpa [#allocation3], 0  ;;  %s1476_s0 = inlined_call_operand.hbm [shape: f32[2,16,256], index: 0, kind: input, shape index: {}]   ;;  %s1477_s1 = inlined_call_operand.hbm [shape: f32[32,16], index: 1, kind: input, shape index: {}]   ;;  %s1478_s2 = inlined_call_operand.hbm [shape: f32[32,1], index: 2, kind: input, shape index: {}]   ;;  %s1479_s3 = inlined_call_operand.hbm [shape: f32[16,48], index: 3, kind: input, shape index: {}]   ;;  %s1480_s4 = inlined_call_operand.hbm [shape: f32[16,1], index: 4, kind: input, shape index: {}]   ;;  %s1481_s5 = inlined_call_operand.hbm [shape: f32[2,16,256], index: 5, kind: output, shape index: {}]  }
   0x1   :  { %12 = vsyncpa [#allocation3 + $0x1], 0 }
   0x2   :  { %13 = vsyncpa [#allocation6], 0 }
   0x3   :  { %14 = vsyncpa [#allocation9], 0 }
   0x4   :  { %15 = vsyncpa [#allocation4], 0 }
   0x5   :  { %17 = vsyncpa [#allocation4 + $0x1], 0  ;;  %s1144_s18 = smov 0   ;;  %s1146_s19 = smov 0  }
   0x6   :  { %s1148_s20 = smov 0   ;;  %s1150_s21 = smov 0  }
   0x7   :  { %s1152_s22 = smov 0   ;;  %s1154_s23 = smov 0  }
   0x8 LB: > { %1488 = sst [smem:[#allocation16_spill]] %s1078_s18  ;;  %s706_s24 = sadd.s32 4294967295, %s1098_s23   ;;  %s1098_s23 = sphi %s1154_s23, %s23_s23   ;;  %s1094_s22 = sphi %s1152_s22, %s1511_s22   ;;  %s1090_s21 = sphi %s1150_s21, %s1510_s21   ;;  %s1086_s20 = sphi %s1148_s20, %s1509_s20   ;;  %s1082_s19 = sphi %s1146_s19, %s1508_s19   ;;  %s1078_s18 = sphi %s1144_s18, %s1507_s18  }
   0x9   : > { %s707_s25 = sadd.s32 4294967294, %s1098_s23   ;;  %p57_p0 = scmp.ne.s32.totalorder %s1082_s19, %s1078_s18 }
   0xa   : > { %p1178_p1 = scmp.eq.s32.totalorder %s706_s24, 0  ;;  %p1182_p2 = scmp.eq.s32.totalorder %s706_s24, 1 }
   0xb   : > { %p173_p3 = scmp.eq.s32.totalorder %s707_s25, 1  ;;  %p708_p5 = scmp.ge.s32.totalorder %s1098_s23, 1 }
   0xc   : > { %s1489_s26 = scalar_select %p1178_p1, 1, 0 }
   0xd   : > { %s1490_s27 = scalar_select %p1182_p2, 1, 0 }
   0xe   : > { %p1188_p4 = por %p1178_p1, %p57_p0  ;;  %p1193_p6 = por %p173_p3, %p57_p0 }
   0xf   : > { %p180_p7 = scmp.lt.s32.totalorder %s1098_s23, 3  ;;  %s1100_s6 = smov [#allocation5]  }
  0x10   : > { %s1491_s28 = scalar_select %p1188_p4, 1, 0 }
  0x11   : > { %s1492_s29 = scalar_select %p1193_p6, 1, 0 }
  0x12   : > { %p1198_p8 = pnand %p708_p5, %p180_p7  ;;  %s192_s7 = sshll.u32 %s1100_s6, 4  ;;  %s1202_s7 = int_to_ptr.vmem [resolvable:$true] %s192_s7 }
  0x13   : > { %1493 = sst [smem:[#allocation17_spill]] %s1492_s29  ;;  %s1101_s9 = smov [#allocation8]  }
  0x14   : > { %s1494_s30 = scalar_select %p1198_p8, 1, 0 }
  0x15   : > { %p773_p9 = pneg %p1198_p8  ;;  %s218_s10 = sshll.u32 %s1101_s9, 4  ;;  %s1213_s10 = int_to_ptr.vmem [resolvable:$true] %s218_s10 }
  0x16   : > { %s1102_s11 = smov [#allocation7]   ;;  %s866_s15 = scalar_lea.hbm %s1477_s1, 512 }
  0x17   : > { %p1209_p11 = pnand %p773_p9, %p1178_p1  ;;  %s1215_s12 = sshll.u32 %s1102_s11, 4  ;;  %s206_s12 = int_to_ptr.vmem [resolvable:$true] %s1215_s12 }
  0x18   : > { %p867_p12 = scmp.ne.s32.totalorder %s1477_s1, %s866_s15  ;;  %p873_p5 = scmp.lt.u32.totalorder %s866_s15, %s1477_s1 }
  0x19   : > { %p1225_p13 = pneg %p1209_p11 }
  0x1b   : > { %p869_p0 = pnand %p1225_p13, %p867_p12 }
  0x1d   : > { %p870_p3 = pneg %p869_p0 }
  0x1f   : > { %p875_p7 = pnand %p873_p5, %p870_p3 }
  0x21   : > { %878 = shalt.err (!%p875_p7)
}
  0x22   : > { %s879_s9 = scalar_lea.vmem %s1202_s7, 512  ;;  %p887_p1 = scmp.lt.s32.totalorder %s1202_s7, %s1202_s7 }
  0x23   : > { %p880_p9 = scmp.ne.s32.totalorder %s1202_s7, %s879_s9  ;;  %p888_p4 = scmp.lt.s32.totalorder %s879_s9, %s879_s9 }
  0x25   : > { %p882_p10 = pnand %p880_p9, %p1225_p13  ;;  %p889_p12 = por %p888_p4, %p887_p1 }
  0x27   : > { %p883_p6 = pneg %p882_p10 }
  0x29   : > { %p890_p0 = pnand %p889_p12, %p883_p6 }
  0x2b   : > { %893 = shalt.err (!%p890_p0)
}
  0x2c   : > { %s1103_s11 = smov 128   ;;  %s1104_s13 = smov 8  }
  0x2d   : > { %776 = dma.hbm_to_vmem [thread:$0]  (!%p1209_p11), %s1477_s1, 512, %s1202_s7, [#allocation6], %s1103_s11, %s1103_s11, %s1104_s13  }
  0x2e   : > { %s894_s25 = scalar_lea.hbm %s1479_s3, 256 }
  0x2f   : > { %p895_p1 = scmp.ne.s32.totalorder %s1479_s3, %s894_s25  ;;  %p901_p10 = scmp.lt.u32.totalorder %s894_s25, %s1479_s3 }
  0x31   : > { %p897_p4 = pnand %p895_p1, %p1225_p13 }
  0x33   : > { %p898_p6 = pneg %p897_p4 }
  0x35   : > { %p903_p3 = pnand %p901_p10, %p898_p6 }
  0x37   : > { %906 = shalt.err (!%p903_p3)
}
  0x38   : > { %s907_s7 = scalar_lea.vmem %s1213_s10, 256  ;;  %p915_p12 = scmp.lt.s32.totalorder %s1213_s10, %s1213_s10 }
  0x39   : > { %p908_p5 = scmp.ne.s32.totalorder %s1213_s10, %s907_s7  ;;  %p916_p0 = scmp.lt.s32.totalorder %s907_s7, %s907_s7 }
  0x3b   : > { %p910_p7 = pnand %p908_p5, %p1225_p13  ;;  %p917_p1 = por %p916_p0, %p915_p12 }
  0x3d   : > { %p911_p9 = pneg %p910_p7 }
  0x3f   : > { %p918_p4 = pnand %p917_p1, %p911_p9 }
  0x41   : > { %921 = shalt.err (!%p918_p4)
}
  0x42   : > { %782 = dma.hbm_to_vmem [thread:$0]  (!%p1209_p11), %s1479_s3, 256, %s1213_s10, [#allocation9], %s1103_s11, %s1103_s11, %s1104_s13  }
  0x43   : > { %s922_s16 = scalar_lea.hbm %s1478_s2, 512 }
  0x44   : > { %p923_p6 = scmp.ne.s32.totalorder %s1478_s2, %s922_s16  ;;  %p929_p5 = scmp.lt.u32.totalorder %s922_s16, %s1478_s2 }
  0x46   : > { %p925_p10 = pnand %p923_p6, %p1225_p13 }
  0x48   : > { %p926_p3 = pneg %p925_p10 }
  0x4a   : > { %p931_p7 = pnand %p929_p5, %p926_p3 }
  0x4c   : > { %934 = shalt.err (!%p931_p7)
}
  0x4d   : > { %s935_s7 = scalar_lea.vmem %s206_s12, 512  ;;  %p943_p1 = scmp.lt.s32.totalorder %s206_s12, %s206_s12 }
  0x4e   : > { %p936_p9 = scmp.ne.s32.totalorder %s206_s12, %s935_s7  ;;  %p944_p4 = scmp.lt.s32.totalorder %s935_s7, %s935_s7 }
  0x50   : > { %p938_p12 = pnand %p936_p9, %p1225_p13  ;;  %p945_p8 = por %p944_p4, %p943_p1 }
  0x52   : > { %p939_p0 = pneg %p938_p12 }
  0x54   : > { %p946_p2 = pnand %p945_p8, %p939_p0 }
  0x56   : > { %949 = shalt.err (!%p946_p2)
}
  0x57   : > { %779 = dma.hbm_to_vmem [thread:$0]  (!%p1209_p11), %s1478_s2, 512, %s206_s12, [#allocation6], %s1103_s11, %s1103_s11, %s1104_s13  }
  0x58   : > { %s1105_s29 = smov [#allocation10]   ;;  %s950_s17 = scalar_lea.hbm %s1480_s4, 256 }
  0x59   : > { %s231_s14 = sshll.u32 %s1105_s29, 4  ;;  %p951_p2 = scmp.ne.s32.totalorder %s1480_s4, %s950_s17  ;;  %s232_s14 = int_to_ptr.vmem [resolvable:$true] %s231_s14 }
  0x5a   : > { %p957_p10 = scmp.lt.u32.totalorder %s950_s17, %s1480_s4 }
  0x5b   : > { %p953_p8 = pnand %p951_p2, %p1225_p13 }
  0x5d   : > { %p954_p6 = pneg %p953_p8 }
  0x5f   : > { %p959_p3 = pnand %p957_p10, %p954_p6 }
  0x61   : > { %962 = shalt.err (!%p959_p3)
}
  0x62   : > { %s963_s12 = scalar_lea.vmem %s232_s14, 256  ;;  %p971_p12 = scmp.lt.s32.totalorder %s232_s14, %s232_s14 }
  0x63   : > { %p964_p5 = scmp.ne.s32.totalorder %s232_s14, %s963_s12  ;;  %p972_p0 = scmp.lt.s32.totalorder %s963_s12, %s963_s12 }
  0x65   : > { %p966_p7 = pnand %p964_p5, %p1225_p13  ;;  %p973_p1 = por %p972_p0, %p971_p12 }
  0x67   : > { %p967_p9 = pneg %p966_p7 }
  0x69   : > { %p974_p4 = pnand %p973_p1, %p967_p9 }
  0x6b   : > { %977 = shalt.err (!%p974_p4)
}
  0x6c   : > { %785 = dma.hbm_to_vmem [thread:$0]  (!%p1209_p11), %s1480_s4, 256, %s232_s14, [#allocation9], %s1103_s11, %s1103_s11, %s1104_s13  }
  0x6d   : > { %s35_s24 = sadd.s32 1, %s1094_s22  ;;  %s44_s8 = sadd.s32 1, %s1086_s20 }
  0x6e   : > { %p37_p13 = scmp.ge.s32.totalorder %s35_s24, 2  ;;  %p51_p2 = scmp.ne.s32.totalorder %s1086_s20, %s1082_s19 }
  0x6f   : > { %p52_p8 = scmp.eq.s32.totalorder %s1098_s23, 0  ;;  %p798_p6 = scmp.lt.s32.totalorder %s1098_s23, 2 }
  0x70   : > { %s1513_s24 = smov (%p37_p13, %s35_s24), 0  ;;  %p1497_p3 = scmp.ne.s32.totalorder %s1490_s27, 0 }
  0x71   : > { %p53_p10 = por %p52_p8, %p51_p2  ;;  %s39_s15 = ssub.s32 %s1094_s22, %s1513_s24 }
  0x72   : > { %p1328_p5 = por %p1497_p3, %p51_p2  ;;  %s245_s16 = sand.u32 1, %s1086_s20  }
  0x73   : > { %p42_p7 = scmp.eq.s32.totalorder %s39_s15, 0  ;;  %s714_s11 = sshll.u32 %s245_s16, 5 }
  0x74   : > { %s735_s13 = sshll.u32 %s1094_s22, 9  ;;  %s249_s27 = scalar_lea.vmem [#allocation2], %s714_s11 }
  0x75   : > { %s1337_s14 = scalar_select %p42_p7, %s1086_s20, %s44_s8  }
  0x76   : > { %s1342_s6 = scalar_lea.hbm %s1476_s0, %s735_s13  ;;  %s258_s9 = sshll.u32 %s249_s27, 4  ;;  %s1350_s9 = int_to_ptr.vmem [resolvable:$true] %s258_s9 }
  0x77   : > { %p1346_p11 = pnand %p798_p6, %p53_p10  ;;  %s1352_s12 = scalar_lea.sflag [#allocation3], %s245_s16 }
  0x78   : > { %s978_s10 = scalar_lea.hbm %s1342_s6, 512  ;;  %s983_s15 = scalar_lea.hbm %s1476_s0, 1024 }
  0x79   : > { %p979_p9 = scmp.ne.s32.totalorder %s1342_s6, %s978_s10  ;;  %p980_p12 = pneg %p1346_p11 }
  0x7a   : > { %p984_p4 = scmp.lt.u32.totalorder %s1342_s6, %s1476_s0  ;;  %p985_p13 = scmp.lt.u32.totalorder %s983_s15, %s978_s10 }
  0x7b   : > { %p981_p0 = pnand %p980_p12, %p979_p9  ;;  %p987_p8 = scmp.lt.u32.totalorder %s978_s10, %s1342_s6 }
  0x7c   : > { %p986_p2 = por %p985_p13, %p984_p4 }
  0x7d   : > { %p982_p1 = pneg %p981_p0 }
  0x7e   : > { %p988_p6 = por %p987_p8, %p986_p2 }
  0x80   : > { %p989_p10 = pnand %p988_p6, %p982_p1 }
  0x82   : > { %992 = shalt.err (!%p989_p10)
}
  0x83   : > { %s993_s16 = scalar_lea.vmem %s1350_s9, 512  ;;  %s1106_s17 = smov [#allocation2]  }
  0x84   : > { %p994_p3 = scmp.ne.s32.totalorder %s1350_s9, %s993_s16  ;;  %s998_s25 = sshll.u32 %s1106_s17, 4  ;;  %s999_s25 = int_to_ptr.vmem [resolvable:$false] %s998_s25 }
  0x85   : > { %s1000_s27 = scalar_lea.vmem %s999_s25, 1024  ;;  %p1001_p0 = scmp.lt.s32.totalorder %s1350_s9, %s999_s25 }
  0x86   : > { %p996_p7 = pnand %p994_p3, %p980_p12  ;;  %p1002_p4 = scmp.lt.s32.totalorder %s1000_s27, %s993_s16 }
  0x88   : > { %p997_p9 = pneg %p996_p7  ;;  %p1003_p13 = por %p1002_p4, %p1001_p0 }
  0x8a   : > { %p1004_p2 = pnand %p1003_p13, %p997_p9 }
  0x8c   : > { %1007 = shalt.err (!%p1004_p2)
}
  0x8d   : > { %s1107_s10 = smov 256   ;;  %s1108_s18 = smov 16  }
  0x8e   : > { %789 = dma.hbm_to_vmem [thread:$0]  (!%p1346_p11), %s1342_s6, 512, %s1350_s9, %s1352_s12, %s1107_s10, %s1107_s10, %s1108_s18  }
  0x8f   : > { %p1500_p12 = scmp.ne.s32.totalorder %s1494_s30, 0 }
  0x90   : > { %s1383_s8 = sand.u32 (!%p1500_p12), 1, %s1082_s19   ;;  %p1501_p1 = scmp.ne.s32.totalorder (!%p1500_p12), %s1491_s28, 0 }
  0x91   : > { %270 = sbr.rel (%p1500_p12) target bundleno = 638 (0x27e), region = 40  ;;  %s718_s15 = sshll.u32 (!%p1500_p12), %s1383_s8, 5 }
  0x92   : > { %s273_s11 = scalar_lea.sflag (!%p1500_p12), [#allocation3], %s1383_s8  ;;  %s276_s13 = scalar_lea.vmem (!%p1500_p12), [#allocation2], %s718_s15 }
  0x98   : > { %1061 = dma.done.wait (%p1501_p1), %s273_s11, 512  }
  0x99   : > { %1063 = vsyncadd (%p1501_p1), %s273_s11, 4294966784  ;;  %p1502_p11 = scmp.ne.s32.totalorder %s1489_s26, 0 }
  0x9b   : > { %1065 = dma.done.wait (%p1502_p11), [#allocation6], 1024  }
  0x9c   : > { %1067 = vsyncadd (%p1502_p11), [#allocation6], 4294966272 }
  0x9d   : > { %1069 = dma.done.wait (%p1502_p11), [#allocation9], 512  }
  0x9e   : > { %1071 = vsyncadd (%p1502_p11), [#allocation9], 4294966784  ;;  %v1109_v0 = vmov 0.0   ;;  %v1110_v1 = vmov 0   ;;  %v322_v2 = vld [vmem:[%s276_s13 + $0x8] sm:$0xff]  ;;  %v324_v3 = vld [vmem:[%s276_s13 + $0x18] sm:$0xff] }
  0x9f   : > { %430 = vmatprep.mubr.f32.mxu0 %v1109_v0  ;;  %864 = vset.pattern.permute.xlu0 %v1110_v1  ;;  %v321_v4 = vld [vmem:[%s276_s13] sm:$0xff]  ;;  %v1403_v5 = vpack.c.bf16 %v324_v3, %v322_v2  ;;  %v323_v6 = vld [vmem:[%s276_s13 + $0x10] sm:$0xff]  ;;  %vm353_vm0 = vcmask 130048   ;;  %v330_v11 = vld [vmem:[#allocation7 + $0x8] sm:$0xff]  ;;  %vm477_vm1 = vcmask 392192   ;;  %s318_s26 = scalar_lea.vmem [#allocation11], %s718_s15 }
  0xa0   : > { %865 = vset.pattern.permute.xlu1 %v1110_v1  ;;  %548 = vmatprep.mubr.f32.mxu1 %v1109_v0  ;;  %v1405_v7 = vpack.c.bf16 %v323_v6, %v321_v4  ;;  %v329_v8 = vld [vmem:[#allocation7] sm:$0xff]  ;;  %v331_v9 = vld [vmem:[#allocation7 + $0x10] sm:$0xff]  ;;  %v332_v12 = vld [vmem:[#allocation7 + $0x18] sm:$0xff]  ;;  %s581_s28 = sshll.u32 %s318_s26, 4  ;;  %s736_s30 = sshll.u32 %s1090_s21, 9  ;;  %s1422_s28 = int_to_ptr.vmem [resolvable:$true] %s581_s28 }
  0xa1   : > { %738 = vmatprep.subr.bf16.mxu0 %v1403_v5  ;;  %335 = vperm.xlu0 %864, %v329_v8   ;;  %v325_v10 = vld [vmem:[#allocation5] sm:$0xff]  ;;  %v326_v13 = vld [vmem:[#allocation5 + $0x8] sm:$0xff]  ;;  %v465_v14 = vld [vmem:[#allocation10] sm:$0xff]  ;;  %s1427_s7 = scalar_lea.hbm %s1481_s5, %s736_s30  ;;  %s566_s21 = scalar_lea.sflag [#allocation4], %s1383_s8 }
  0xa2   : > { %740 = vmatpush1.bf16.msra.mxu0 %v1405_v7  ;;  %345 = vperm.xlu1 %865, %v331_v9   ;;  %v466_v15 = vld [vmem:[#allocation10 + $0x8] sm:$0xff]  ;;  %v327_v16 = vld [vmem:[#allocation5 + $0x10] sm:$0xff]  ;;  %v463_v50 = vld [vmem:[#allocation8] sm:$0xff]  ;;  %s1008_s12 = scalar_lea.vmem %s1422_s28, 512  ;;  %s1111_s16 = smov [#allocation11]  }
  0xa3   : > { %v328_v17 = vld [vmem:[#allocation5 + $0x18] sm:$0xff]  ;;  %v464_v51 = vld [vmem:[#allocation8 + $0x8] sm:$0xff]  ;;  %p1009_p8 = scmp.ne.s32.totalorder %s1422_s28, %s1008_s12  ;;  %s1012_s17 = sshll.u32 %s1111_s16, 4  ;;  %s1013_s17 = int_to_ptr.vmem [resolvable:$false] %s1012_s17 }
  0xa4   : > { %s1014_s25 = scalar_lea.vmem %s1013_s17, 1024  ;;  %p1015_p3 = scmp.lt.s32.totalorder %s1422_s28, %s1013_s17 }
  0xa5   : > { %724 = vmatmul.mubr.msk.f32.vlgmr.msra.gmra.mrb[0].mxu0 %vm353_vm0, %v325_v10  ;;  %340 = vperm.xlu0 %864, %v330_v11   ;;  %p1010_p6 = pnand %p1009_p8, %p1328_p5  ;;  %p1016_p7 = scmp.lt.s32.totalorder %s1014_s25, %s1008_s12 }
  0xa6   : > { %436 = vmatprep.mubr.f32.mxu0 %v1109_v0  ;;  %350 = vperm.xlu1 %865, %v332_v12  }
  0xa7   : > { %p1011_p10 = pneg %p1010_p6  ;;  %p1017_p9 = por %p1016_p7, %p1015_p3 }
  0xa9   : > { %725 = vmatmul.mubr.msk.f32.gmra.mrb[2].mxu0 %vm353_vm0, %v326_v13  ;;  %469 = vperm.xlu0 %864, %v465_v14   ;;  %p1018_p0 = pnand %p1017_p9, %p1011_p10 }
  0xaa   : > { %442 = vmatprep.mubr.f32.mxu0 %v1109_v0  ;;  %474 = vperm.xlu1 %865, %v466_v15  }
  0xad   : > { %726 = vmatmul.mubr.msk.f32.gmra.mrb[4].mxu0 %vm353_vm0, %v327_v16 }
  0xae   : > { %448 = vmatprep.mubr.f32.mxu0 %v1109_v0 }
  0xb1   : > { %727 = vmatmul.mubr.msk.f32.gmra.mrb[6].mxu0 %vm353_vm0, %v328_v17 }
 0x120   : > { %v336_v18 = vpop.permute.xlu0 %335 }
 0x121   : > { %v346_v27 = vpop.permute.xlu1 %345 }
 0x124   : > { %v341_v22 = vpop.permute.xlu0 %340 }
 0x125   : > { %v351_v38 = vpop.permute.xlu1 %350 }
 0x128   : > { %v470_v52 = vpop.permute.xlu0 %469 }
 0x129   : > { %v475_v57 = vpop.permute.xlu1 %474 }
 0x178   : > { %v432_v19 = vpop.f32.mrb[0].mxu0 }
 0x179   : > { %v434_v20 = vpop.f32.mrb[1].mxu0  ;;  %v433_v21 = vadd.f32 %v432_v19, %v336_v18 }
 0x17a   : > { %v435_v23 = vadd.f32 %v434_v20, %v336_v18 }
 0x17b   : > { %v455_v29 = vmax.f32 %v433_v21, 0.0 }
 0x17c   : > { %v438_v24 = vpop.f32.mrb[2].mxu0  ;;  %v456_v31 = vmax.f32 %v435_v23, 0.0 }
 0x17d   : > { %v439_v25 = vadd.f32 %v438_v24, %v341_v22  ;;  %v440_v26 = vpop.f32.mrb[3].mxu0 }
 0x17e   : > { %v441_v28 = vadd.f32 %v440_v26, %v341_v22 }
 0x17f   : > { %v457_v30 = vmax.f32 %v439_v25, 0.0 }
 0x180   : > { %v458_v32 = vmax.f32 %v441_v28, 0.0  ;;  %v444_v33 = vpop.f32.mrb[4].mxu0 }
 0x181   : > { %v446_v34 = vpop.f32.mrb[5].mxu0  ;;  %v743_v35 = vpack.c.bf16 %v457_v30, %v455_v29  ;;  %v445_v37 = vadd.f32 %v444_v33, %v346_v27 }
 0x182   : > { %v741_v36 = vpack.c.bf16 %v458_v32, %v456_v31  ;;  %v447_v39 = vadd.f32 %v446_v34, %v346_v27 }
 0x183   : > { %v459_v44 = vmax.f32 %v445_v37, 0.0 }
 0x184   : > { %v450_v40 = vpop.f32.mrb[6].mxu0  ;;  %742 = vmatprep.subr.bf16.mxu1 %v741_v36  ;;  %v460_v46 = vmax.f32 %v447_v39, 0.0 }
 0x185   : > { %v451_v41 = vadd.f32 %v450_v40, %v351_v38  ;;  %v452_v42 = vpop.f32.mrb[7].mxu0  ;;  %744 = vmatpush1.bf16.msra.mxu1 %v743_v35 }
 0x186   : > { %v453_v43 = vadd.f32 %v452_v42, %v351_v38 }
 0x187   : > { %v461_v45 = vmax.f32 %v451_v41, 0.0 }
 0x188   : > { %v462_v47 = vmax.f32 %v453_v43, 0.0 }
 0x189   : > { %v747_v48 = vpack.c.bf16 %v461_v45, %v459_v44 }
 0x18a   : > { %v745_v49 = vpack.c.bf16 %v462_v47, %v460_v46 }
 0x18c   : > { %746 = vmatprep.subr.bf16.mxu1 %v745_v49 }
 0x18d   : > { %748 = vmatpush1.bf16.msra.mxu1 %v747_v48 }
 0x18e   : > { %750 = vmatprep.subr.bf16.mxu1 %v1403_v5 }
 0x191   : > { %752 = vmatpush1.bf16.msra.mxu1 %v1405_v7 }
 0x194   : > { %728 = vmatmul.mubr.msk.f32.vlgmr.msra.gmra.mrb[0].mxu1 %vm477_vm1, %v463_v50 }
 0x195   : > { %554 = vmatprep.mubr.f32.mxu1 %v1109_v0 }
 0x198   : > { %729 = vmatmul.mubr.msk.f32.gmra.mrb[2].mxu1 %vm477_vm1, %v464_v51 }
 0x267   : > { %v550_v53 = vpop.f32.mrb[0].mxu1 }
 0x268   : > { %v551_v54 = vadd.f32 %v550_v53, %v470_v52  ;;  %v552_v55 = vpop.f32.mrb[1].mxu1 }
 0x269   : > { %v553_v56 = vadd.f32 %v552_v55, %v470_v52 }
 0x26a   : > { %561 = vst [vmem:[%s318_s26] sm:$0xff] %v551_v54 }
 0x26b   : > { %562 = vst [vmem:[%s318_s26 + $0x8] sm:$0xff] %v553_v56  ;;  %v556_v58 = vpop.f32.mrb[2].mxu1 }
 0x26c   : > { %v557_v59 = vadd.f32 %v556_v58, %v475_v57  ;;  %v558_v60 = vpop.f32.mrb[3].mxu1 }
 0x26d   : > { %v559_v61 = vadd.f32 %v558_v60, %v475_v57 }
 0x26e   : > { %563 = vst [vmem:[%s318_s26 + $0x10] sm:$0xff] %v557_v59 }
 0x26f   : > { %564 = vst [vmem:[%s318_s26 + $0x18] sm:$0xff] %v559_v61 }
 0x270   : > { %1021 = shalt.err (!%p1018_p0)
}
 0x271   : > { %s1022_s27 = scalar_lea.hbm %s1427_s7, 512  ;;  %s1026_s15 = scalar_lea.hbm %s1481_s5, 1024 }
 0x272   : > { %p1023_p4 = scmp.ne.s32.totalorder %s1427_s7, %s1022_s27  ;;  %p1027_p12 = scmp.lt.u32.totalorder %s1427_s7, %s1481_s5 }
 0x273   : > { %p1028_p1 = scmp.lt.u32.totalorder %s1026_s15, %s1022_s27  ;;  %p1030_p8 = scmp.lt.u32.totalorder %s1022_s27, %s1427_s7 }
 0x274   : > { %p1024_p13 = pnand %p1023_p4, %p1328_p5 }
 0x275   : > { %p1029_p11 = por %p1028_p1, %p1027_p12 }
 0x276   : > { %p1025_p2 = pneg %p1024_p13 }
 0x277   : > { %p1031_p6 = por %p1030_p8, %p1029_p11 }
 0x279   : > { %p1032_p10 = pnand %p1031_p6, %p1025_p2 }
 0x27b   : > { %1035 = shalt.err (!%p1032_p10)
}
 0x27c   : > { %s1112_s26 = smov 256   ;;  %s1113_s30 = smov 16  }
 0x27d   : > { %771 = dma.vmem_to_hbm [thread:$0]  (%p1328_p5), %s1422_s28, 512, %s1427_s7, %s566_s21, %s1112_s26, %s1112_s26, %s1113_s30  }
 0x27e PF: > { %s1503_s6 = sld [smem:[#allocation16_spill]]  ;;  %s1504_s9 = sld [smem:[#allocation17_spill]] }
 0x27f   : > { %p1506_p7 = scmp.ge.s32.totalorder %s1098_s23, 2 }
 0x284   : > { %s596_s12 = sand.u32 1, %s1503_s6   ;;  %p1505_p3 = scmp.ne.s32.totalorder %s1504_s9, 0 }
 0x285   : > { %s597_s16 = scalar_lea.sflag [#allocation4], %s596_s12 }
 0x286   : > { %p791_p9 = pnand %p1506_p7, %p1505_p3 }
 0x288   : > { %1073 = dma.done.wait (!%p791_p9), %s597_s16, 512  }
 0x289   : > { %1075 = vsyncadd (!%p791_p9), %s597_s16, 4294966784  ;;  %s23_s23 = sadd.s32 1, %s1098_s23   ;;  %s1507_s18 = smov %s1082_s19 }
 0x28a   : > { %p20_p0 = scmp.ge.s32.totalorder %s23_s23, 4   ;;  %s1508_s19 = smov %s1086_s20 }
 0x28b   : > { %s1509_s20 = smov %s1337_s14  ;;  %s1510_s21 = smov %s1094_s22 }
 0x28c   : > { %s1511_s22 = smov %s1513_s24  ;;  %22 = sbr.rel (!%p20_p0) target bundleno = 8 (0x8), region = 101 }
 0x293   :  { %602 = vsyncpa [#allocation3], 1 }
 0x294   :  { %604 = vsyncpa [#allocation3 + $0x1], 1 }
 0x295   :  { %605 = vsyncpa [#allocation6], 1 }
 0x296   :  { %606 = vsyncpa [#allocation9], 1 }
 0x297   :  { %607 = vsyncpa [#allocation4], 1 }
 0x298   :  { %609 = vsyncpa [#allocation4 + $0x1], 1 }

</bundles_post_ra>
